<compile_context>
chip_gen: v7x
topology: tpu7x:2x2x1
jax: 0.10.0
libtpu: 0.0.40
codegen_flags: <defaults>
</compile_context>

<pallas_src>
import jax
import jax.numpy as jnp
from jax.experimental import pallas as pl
from jax.experimental.pallas import tpu as pltpu

NUM_CLASSES = 2     # real output classes
OUT_PAD = 128       # lane-dense output tile width (sliced to NUM_CLASSES outside)


def _sigmoid(z):
    # logistic(z) == 0.5*(tanh(z/2)+1): tanh runs on the EUP (otherwise idle
    # here) instead of an exp + VPU divide per layer.  Mathematically exact.
    return 0.5 * (jnp.tanh(0.5 * z) + 1.0)


def dnn_kernel(x_ref, w1_ref, b1_ref, w2_ref, b2_ref,
               w3_ref, b3_ref, w4_ref, b4_ref, o_ref):
    x = x_ref[...]                                            # [bb, horizon] f32
    h = _sigmoid(jnp.dot(x, w1_ref[...],
                         preferred_element_type=jnp.float32) + b1_ref[...])
    h = _sigmoid(jnp.dot(h, w2_ref[...],
                         preferred_element_type=jnp.float32) + b2_ref[...])
    h = _sigmoid(jnp.dot(h, w3_ref[...],
                         preferred_element_type=jnp.float32) + b3_ref[...])
    logits = (jnp.dot(h, w4_ref[...],
                      preferred_element_type=jnp.float32) + b4_ref[...])
    # logits: [bb, 128]; lanes >= NUM_CLASSES carry exactly 0 (zero-padded
    # weights/bias), lanes < NUM_CLASSES carry the real logits.

    # Numerically stable softmax over the 2 real classes (torch dim=1).
    # max over all 128 lanes = max(real_max, 0): a valid (shift-invariant)
    # softmax stabilizer, so nothing huge/inf ever reaches exp().
    lane = jax.lax.broadcasted_iota(jnp.int32, logits.shape, 1)
    valid = lane < NUM_CLASSES
    m = jnp.max(logits, axis=-1, keepdims=True)
    e = jnp.where(valid, jnp.exp(logits - m), 0.0)
    denom = jnp.sum(e, axis=-1, keepdims=True)
    o_ref[...] = e / denom          # exact divide: rows sum to 1 to ~1 ulp


def dnn_forward(x, params, *, block_b=512):
    """x: [batch, horizon] float32. Returns softmax probabilities [batch, 2]."""
    B, horizon = x.shape
    w1, b1 = params["w1"], params["b1"]
    w2, b2 = params["w2"], params["b2"]
    w3, b3 = params["w3"], params["b3"]
    w4, b4 = params["w4"], params["b4"]

    # Zero-pad the 2-wide final layer to 128 output lanes -> lane-dense,
    # unmasked output stores.  Padded lanes are masked to 0 in the kernel.
    w4p = jnp.pad(w4, ((0, 0), (0, OUT_PAD - w4.shape[1])))
    b4p = jnp.pad(b4, ((0, 0), (0, OUT_PAD - b4.shape[1])))

    # Batch tile: multiple of 8 sublanes, capped at block_b.
    bb = min(block_b, ((B + 7) // 8) * 8)
    bb = max(8, (bb // 8) * 8)
    Bp = ((B + bb - 1) // bb) * bb
    if Bp != B:
        x = jnp.pad(x, ((0, Bp - B), (0, 0)))
    grid = (Bp // bb,)

    def resident(a):
        # Full-array block with a constant block index: DMA'd once, stays
        # VMEM-resident across all grid steps.
        return pl.BlockSpec(a.shape, lambda i: (0,) * a.ndim)

    out = pl.pallas_call(
        dnn_kernel,
        out_shape=jax.ShapeDtypeStruct((Bp, OUT_PAD), jnp.float32),
        grid=grid,
        in_specs=[pl.BlockSpec((bb, horizon), lambda i: (i, 0)),
                  resident(w1), resident(b1),
                  resident(w2), resident(b2),
                  resident(w3), resident(b3),
                  resident(w4p), resident(b4p)],
        out_specs=pl.BlockSpec((bb, OUT_PAD), lambda i: (i, 0)),
        compiler_params=pltpu.CompilerParams(
            dimension_semantics=("parallel",)),   # dual-TC on v7x
    )(x, w1, b1, w2, b2, w3, b3, w4p, b4p)
    return out[:B, :NUM_CLASSES]


def init_params(key, horizon, h1, h2, h3):
    """torch.nn.Linear-style init (uniform +-1/sqrt(fan_in)); weights stored
    as [in, out] (transposed vs torch)."""
    dims = [(horizon, h1), (h1, h2), (h2, h3), (h3, NUM_CLASSES)]
    params = {}
    for i, (fin, fout) in enumerate(dims, start=1):
        key, kw, kb = jax.random.split(key, 3)
        bound = 1.0 / float(fin) ** 0.5
        params[f"w{i}"] = jax.random.uniform(
            kw, (fin, fout), jnp.float32, minval=-bound, maxval=bound)
        params[f"b{i}"] = jax.random.uniform(
            kb, (1, fout), jnp.float32, minval=-bound, maxval=bound)
    return params


def dnn_reference(x, params):
    """Pure-JAX reference matching the torch forward pass."""
    h = jax.nn.sigmoid(x @ params["w1"] + params["b1"])
    h = jax.nn.sigmoid(h @ params["w2"] + params["b2"])
    h = jax.nn.sigmoid(h @ params["w3"] + params["b3"])
    logits = h @ params["w4"] + params["b4"]
    return jax.nn.softmax(logits, axis=1)


if __name__ == "__main__":
    # args: horizon=16, hidden1=32, hidden2=32, hidden3=16
    horizon, hidden1, hidden2, hidden3 = 16, 32, 32, 16
    batch = 8

    key = jax.random.PRNGKey(0)
    key, kx = jax.random.split(key)
    x = jax.random.normal(kx, (batch, horizon), jnp.float32)
    params = init_params(key, horizon, hidden1, hidden2, hidden3)

    out = jax.block_until_ready(dnn_forward(x, params))
    ref = dnn_reference(x, params)

    assert out.shape == (batch, NUM_CLASSES)
    assert jnp.allclose(jnp.sum(out, axis=1), 1.0, atol=1e-3)
    assert jnp.allclose(out, ref, atol=2e-3, rtol=2e-3)

    # Also exercise a multi-step grid (grid > 1, batch not a tile multiple).
    key, kx2 = jax.random.split(key)
    x2 = jax.random.normal(kx2, (300, horizon), jnp.float32)
    out2 = jax.block_until_ready(dnn_forward(x2, params, block_b=128))
    ref2 = dnn_reference(x2, params)
    assert out2.shape == (300, NUM_CLASSES)
    assert jnp.allclose(jnp.sum(out2, axis=1), 1.0, atol=1e-3)
    assert jnp.allclose(out2, ref2, atol=2e-3, rtol=2e-3)

    # TODO(synk): the module's debug `print(out)` side effect is intentionally
    # not replicated inside the kernel.
    print("KERNEL_OK")
</pallas_src>

<mosaic_0001>
module attributes {stable_mosaic.version = 11 : i64} {
  func.func @dnn_kernel(%arg0: i32, %arg1: memref<8x16xf32, #tpu.memory_space<vmem>>, %arg2: memref<16x32xf32, #tpu.memory_space<vmem>>, %arg3: memref<1x32xf32, #tpu.memory_space<vmem>>, %arg4: memref<32x32xf32, #tpu.memory_space<vmem>>, %arg5: memref<1x32xf32, #tpu.memory_space<vmem>>, %arg6: memref<32x16xf32, #tpu.memory_space<vmem>>, %arg7: memref<1x16xf32, #tpu.memory_space<vmem>>, %arg8: memref<16x128xf32, #tpu.memory_space<vmem>>, %arg9: memref<1x128xf32, #tpu.memory_space<vmem>>, %arg10: memref<8x128xf32, #tpu.memory_space<vmem>>) attributes {dimension_semantics = [#tpu.dimension_semantics<parallel>], iteration_bounds = array<i64: 1>, scalar_prefetch = 0 : i64, scratch_operands = 0 : i64, tpu.core_type = #tpu.core_type<tc>, window_params = [{transform_indices = @transform_0, window_bounds = array<i64: 8, 16>}, {pipeline_mode = #tpu.pipeline_mode<synchronous>, transform_indices = @transform_1, window_bounds = array<i64: 16, 32>}, {pipeline_mode = #tpu.pipeline_mode<synchronous>, transform_indices = @transform_2, window_bounds = array<i64: 1, 32>}, {pipeline_mode = #tpu.pipeline_mode<synchronous>, transform_indices = @transform_3, window_bounds = array<i64: 32, 32>}, {pipeline_mode = #tpu.pipeline_mode<synchronous>, transform_indices = @transform_4, window_bounds = array<i64: 1, 32>}, {pipeline_mode = #tpu.pipeline_mode<synchronous>, transform_indices = @transform_5, window_bounds = array<i64: 32, 16>}, {pipeline_mode = #tpu.pipeline_mode<synchronous>, transform_indices = @transform_6, window_bounds = array<i64: 1, 16>}, {pipeline_mode = #tpu.pipeline_mode<synchronous>, transform_indices = @transform_7, window_bounds = array<i64: 16, 128>}, {pipeline_mode = #tpu.pipeline_mode<synchronous>, transform_indices = @transform_8, window_bounds = array<i64: 1, 128>}, {transform_indices = @transform_9, window_bounds = array<i64: 8, 128>}]} {
    %c0 = arith.constant 0 : index
    %c0_0 = arith.constant 0 : index
    %0 = vector.load %arg1[%c0, %c0_0] : memref<8x16xf32, #tpu.memory_space<vmem>>, vector<8x16xf32>
    %c0_1 = arith.constant 0 : index
    %c0_2 = arith.constant 0 : index
    %1 = vector.load %arg2[%c0_1, %c0_2] : memref<16x32xf32, #tpu.memory_space<vmem>>, vector<16x32xf32>
    %cst = arith.constant dense<0.000000e+00> : vector<8x32xf32>
    %2 = tpu.matmul %0, %1, %cst {dimension_numbers = #tpu.dot_dimension_numbers<[1], [0], [0], [1], [0, 0, 1, 1], [], []>} : vector<8x16xf32>, vector<16x32xf32>, vector<8x32xf32> -> vector<8x32xf32>
    %c0_3 = arith.constant 0 : index
    %c0_4 = arith.constant 0 : index
    %3 = vector.load %arg3[%c0_3, %c0_4] : memref<1x32xf32, #tpu.memory_space<vmem>>, vector<1x32xf32>
    %4 = vector.broadcast %3 : vector<1x32xf32> to vector<8x32xf32>
    %5 = arith.addf %2, %4 : vector<8x32xf32>
    %cst_5 = arith.constant 5.000000e-01 : f32
    %6 = vector.broadcast %cst_5 : f32 to vector<8x32xf32>
    %7 = arith.mulf %6, %5 : vector<8x32xf32>
    %8 = math.tanh %7 : vector<8x32xf32>
    %cst_6 = arith.constant 1.000000e+00 : f32
    %9 = vector.broadcast %cst_6 : f32 to vector<8x32xf32>
    %10 = arith.addf %8, %9 : vector<8x32xf32>
    %cst_7 = arith.constant 5.000000e-01 : f32
    %11 = vector.broadcast %cst_7 : f32 to vector<8x32xf32>
    %12 = arith.mulf %11, %10 : vector<8x32xf32>
    %c0_8 = arith.constant 0 : index
    %c0_9 = arith.constant 0 : index
    %13 = vector.load %arg4[%c0_8, %c0_9] : memref<32x32xf32, #tpu.memory_space<vmem>>, vector<32x32xf32>
    %cst_10 = arith.constant dense<0.000000e+00> : vector<8x32xf32>
    %14 = tpu.matmul %12, %13, %cst_10 {dimension_numbers = #tpu.dot_dimension_numbers<[1], [0], [0], [1], [0, 0, 1, 1], [], []>} : vector<8x32xf32>, vector<32x32xf32>, vector<8x32xf32> -> vector<8x32xf32>
    %c0_11 = arith.constant 0 : index
    %c0_12 = arith.constant 0 : index
    %15 = vector.load %arg5[%c0_11, %c0_12] : memref<1x32xf32, #tpu.memory_space<vmem>>, vector<1x32xf32>
    %16 = vector.broadcast %15 : vector<1x32xf32> to vector<8x32xf32>
    %17 = arith.addf %14, %16 : vector<8x32xf32>
    %cst_13 = arith.constant 5.000000e-01 : f32
    %18 = vector.broadcast %cst_13 : f32 to vector<8x32xf32>
    %19 = arith.mulf %18, %17 : vector<8x32xf32>
    %20 = math.tanh %19 : vector<8x32xf32>
    %cst_14 = arith.constant 1.000000e+00 : f32
    %21 = vector.broadcast %cst_14 : f32 to vector<8x32xf32>
    %22 = arith.addf %20, %21 : vector<8x32xf32>
    %cst_15 = arith.constant 5.000000e-01 : f32
    %23 = vector.broadcast %cst_15 : f32 to vector<8x32xf32>
    %24 = arith.mulf %23, %22 : vector<8x32xf32>
    %c0_16 = arith.constant 0 : index
    %c0_17 = arith.constant 0 : index
    %25 = vector.load %arg6[%c0_16, %c0_17] : memref<32x16xf32, #tpu.memory_space<vmem>>, vector<32x16xf32>
    %cst_18 = arith.constant dense<0.000000e+00> : vector<8x16xf32>
    %26 = tpu.matmul %24, %25, %cst_18 {dimension_numbers = #tpu.dot_dimension_numbers<[1], [0], [0], [1], [0, 0, 1, 1], [], []>} : vector<8x32xf32>, vector<32x16xf32>, vector<8x16xf32> -> vector<8x16xf32>
    %c0_19 = arith.constant 0 : index
    %c0_20 = arith.constant 0 : index
    %27 = vector.load %arg7[%c0_19, %c0_20] : memref<1x16xf32, #tpu.memory_space<vmem>>, vector<1x16xf32>
    %28 = vector.broadcast %27 : vector<1x16xf32> to vector<8x16xf32>
    %29 = arith.addf %26, %28 : vector<8x16xf32>
    %cst_21 = arith.constant 5.000000e-01 : f32
    %30 = vector.broadcast %cst_21 : f32 to vector<8x16xf32>
    %31 = arith.mulf %30, %29 : vector<8x16xf32>
    %32 = math.tanh %31 : vector<8x16xf32>
    %cst_22 = arith.constant 1.000000e+00 : f32
    %33 = vector.broadcast %cst_22 : f32 to vector<8x16xf32>
    %34 = arith.addf %32, %33 : vector<8x16xf32>
    %cst_23 = arith.constant 5.000000e-01 : f32
    %35 = vector.broadcast %cst_23 : f32 to vector<8x16xf32>
    %36 = arith.mulf %35, %34 : vector<8x16xf32>
    %c0_24 = arith.constant 0 : index
    %c0_25 = arith.constant 0 : index
    %37 = vector.load %arg8[%c0_24, %c0_25] : memref<16x128xf32, #tpu.memory_space<vmem>>, vector<16x128xf32>
    %cst_26 = arith.constant dense<0.000000e+00> : vector<8x128xf32>
    %38 = tpu.matmul %36, %37, %cst_26 {dimension_numbers = #tpu.dot_dimension_numbers<[1], [0], [0], [1], [0, 0, 1, 1], [], []>} : vector<8x16xf32>, vector<16x128xf32>, vector<8x128xf32> -> vector<8x128xf32>
    %c0_27 = arith.constant 0 : index
    %c0_28 = arith.constant 0 : index
    %39 = vector.load %arg9[%c0_27, %c0_28] : memref<1x128xf32, #tpu.memory_space<vmem>>, vector<1x128xf32>
    %40 = vector.broadcast %39 : vector<1x128xf32> to vector<8x128xf32>
    %41 = arith.addf %38, %40 : vector<8x128xf32>
    %42 = tpu.iota {dimensions = array<i32: 1>} : vector<8x128xi32>
    %c2_i32 = arith.constant 2 : i32
    %43 = vector.broadcast %c2_i32 : i32 to vector<8x128xi32>
    %44 = arith.cmpi slt, %42, %43 : vector<8x128xi32>
    %cst_29 = arith.constant dense<0xFF800000> : vector<8xf32>
    %45 = vector.multi_reduction <maximumf>, %41, %cst_29 [1] : vector<8x128xf32> to vector<8xf32>
    %46 = vector.shape_cast %45 : vector<8xf32> to vector<8x1xf32>
    %47 = vector.broadcast %46 : vector<8x1xf32> to vector<8x128xf32>
    %48 = arith.subf %41, %47 : vector<8x128xf32>
    %49 = math.exp %48 : vector<8x128xf32>
    %cst_30 = arith.constant 0.000000e+00 : f32
    %50 = vector.broadcast %cst_30 : f32 to vector<8x128xf32>
    %51 = arith.select %44, %49, %50 : vector<8x128xi1>, vector<8x128xf32>
    %cst_31 = arith.constant dense<0.000000e+00> : vector<8xf32>
    %52 = vector.multi_reduction <add>, %51, %cst_31 [1] : vector<8x128xf32> to vector<8xf32>
    %53 = vector.shape_cast %52 : vector<8xf32> to vector<8x1xf32>
    %54 = vector.broadcast %53 : vector<8x1xf32> to vector<8x128xf32>
    %55 = arith.divf %51, %54 : vector<8x128xf32>
    %c0_32 = arith.constant 0 : index
    %c0_33 = arith.constant 0 : index
    %56 = vector.load %arg10[%c0_32, %c0_33] : memref<8x128xf32, #tpu.memory_space<vmem>>, vector<8x128xf32>
    tpu.vector_store %arg10[%c0_32, %c0_33], %55 {strides = array<i32>} : memref<8x128xf32, #tpu.memory_space<vmem>>, vector<8x128xf32>,
    return
  }
  func.func @transform_0(%arg0: i32) -> (i32, i32) {
    %c0_i32 = arith.constant 0 : i32
    %c0_i32_0 = arith.constant 0 : i32
    return %arg0, %c0_i32 : i32, i32
  }
  func.func @transform_1(%arg0: i32) -> (i32, i32) {
    %c0_i32 = arith.constant 0 : i32
    %c0_i32_0 = arith.constant 0 : i32
    %c0_i32_1 = arith.constant 0 : i32
    return %c0_i32, %c0_i32_0 : i32, i32
  }
  func.func @transform_2(%arg0: i32) -> (i32, i32) {
    %c0_i32 = arith.constant 0 : i32
    %c0_i32_0 = arith.constant 0 : i32
    %c0_i32_1 = arith.constant 0 : i32
    return %c0_i32, %c0_i32_0 : i32, i32
  }
  func.func @transform_3(%arg0: i32) -> (i32, i32) {
    %c0_i32 = arith.constant 0 : i32
    %c0_i32_0 = arith.constant 0 : i32
    %c0_i32_1 = arith.constant 0 : i32
    return %c0_i32, %c0_i32_0 : i32, i32
  }
  func.func @transform_4(%arg0: i32) -> (i32, i32) {
    %c0_i32 = arith.constant 0 : i32
    %c0_i32_0 = arith.constant 0 : i32
    %c0_i32_1 = arith.constant 0 : i32
    return %c0_i32, %c0_i32_0 : i32, i32
  }
  func.func @transform_5(%arg0: i32) -> (i32, i32) {
    %c0_i32 = arith.constant 0 : i32
    %c0_i32_0 = arith.constant 0 : i32
    %c0_i32_1 = arith.constant 0 : i32
    return %c0_i32, %c0_i32_0 : i32, i32
  }
  func.func @transform_6(%arg0: i32) -> (i32, i32) {
    %c0_i32 = arith.constant 0 : i32
    %c0_i32_0 = arith.constant 0 : i32
    %c0_i32_1 = arith.constant 0 : i32
    return %c0_i32, %c0_i32_0 : i32, i32
  }
  func.func @transform_7(%arg0: i32) -> (i32, i32) {
    %c0_i32 = arith.constant 0 : i32
    %c0_i32_0 = arith.constant 0 : i32
    %c0_i32_1 = arith.constant 0 : i32
    return %c0_i32, %c0_i32_0 : i32, i32
  }
  func.func @transform_8(%arg0: i32) -> (i32, i32) {
    %c0_i32 = arith.constant 0 : i32
    %c0_i32_0 = arith.constant 0 : i32
    %c0_i32_1 = arith.constant 0 : i32
    return %c0_i32, %c0_i32_0 : i32, i32
  }
  func.func @transform_9(%arg0: i32) -> (i32, i32) {
    %c0_i32 = arith.constant 0 : i32
    %c0_i32_0 = arith.constant 0 : i32
    return %arg0, %c0_i32 : i32, i32
  }
}

</mosaic_0001>

<bundles_post_ra>
// kernel: tpu_custom_call.1
= control target key start
LH: loop header
LB: loop body
LE: loop exit
PB: predicated region body
PF: predicated region fallthrough
CT: control target
= control target key end

     0   :  { %14 = vsyncpa [#allocation3], 0  ;;  %s755_s0 = inlined_call_operand.hbm [shape: f32[8,16], index: 0, kind: input, shape index: {}]   ;;  %s756_s1 = inlined_call_operand.vmem [shape: f32[16,32], index: 1, kind: input, shape index: {}]   ;;  %s757_s2 = inlined_call_operand.vmem [shape: f32[1,32], index: 2, kind: input, shape index: {}]   ;;  %s758_s3 = inlined_call_operand.vmem [shape: f32[32,32], index: 3, kind: input, shape index: {}]   ;;  %s759_s4 = inlined_call_operand.vmem [shape: f32[1,32], index: 4, kind: input, shape index: {}]   ;;  %s760_s5 = inlined_call_operand.vmem [shape: f32[32,16], index: 5, kind: input, shape index: {}]   ;;  %s761_s6 = inlined_call_operand.vmem [shape: f32[1,16], index: 6, kind: input, shape index: {}]   ;;  %s762_s7 = inlined_call_operand.hbm [shape: f32[16,128], index: 7, kind: input, shape index: {}]   ;;  %s763_s8 = inlined_call_operand.vmem [shape: f32[1,128], index: 8, kind: input, shape index: {}]   ;;  %s764_s9 = inlined_call_operand.hbm [shape: f32[8,128], index: 9, kind: output, shape index: {}]  }
   0x1   :  { %15 = vsyncpa [#allocation6], 0 }
   0x2   :  { %16 = vsyncpa [#allocation4], 0  ;;  %s604_s30 = smov [#allocation2]   ;;  %s605_s11 = smov [#allocation5]  }
   0x3   :  { %s23_s10 = sshll.u32 %s604_s30, 4  ;;  %s44_s12 = sshll.u32 %s605_s11, 4  ;;  %s24_s10 = int_to_ptr.vmem [resolvable:$true] %s23_s10  ;;  %s662_s12 = int_to_ptr.vmem [resolvable:$true] %s44_s12 }
   0x4   :  { %s532_s15 = scalar_lea.hbm %s755_s0, 128 }
   0x5   :  { %p533_p0 = scmp.ne.s32.totalorder %s755_s0, %s532_s15  ;;  %p536_p1 = scmp.lt.u32.totalorder %s532_s15, %s755_s0 }
   0x7   :  { %p538_p2 = pnand %p536_p1, %p533_p0 }
   0x9   :  { %541 = shalt.err (!%p538_p2)
}
   0xa   :  { %s542_s20 = scalar_lea.vmem %s24_s10, 128  ;;  %p547_p4 = scmp.lt.s32.totalorder %s24_s10, %s24_s10 }
   0xb   :  { %p543_p3 = scmp.ne.s32.totalorder %s24_s10, %s542_s20  ;;  %p548_p5 = scmp.lt.s32.totalorder %s542_s20, %s542_s20 }
   0xd   :  { %p549_p6 = por %p548_p5, %p547_p4 }
   0xf   :  { %p550_p7 = pnand %p549_p6, %p543_p3 }
  0x11   :  { %553 = shalt.err (!%p550_p7)
}
  0x12   :  { %26 = dma.hbm_to_vmem [thread:$0]  %s755_s0, 128, %s24_s10, [#allocation3]  }
  0x13   :  { %s554_s25 = scalar_lea.hbm %s762_s7, 256 }
  0x14   :  { %p555_p8 = scmp.ne.s32.totalorder %s762_s7, %s554_s25  ;;  %p558_p9 = scmp.lt.u32.totalorder %s554_s25, %s762_s7 }
  0x16   :  { %p560_p10 = pnand %p558_p9, %p555_p8 }
  0x18   :  { %563 = shalt.err (!%p560_p10)
}
  0x19   :  { %s564_s30 = scalar_lea.vmem %s662_s12, 256  ;;  %p569_p12 = scmp.lt.s32.totalorder %s662_s12, %s662_s12 }
  0x1a   :  { %p565_p11 = scmp.ne.s32.totalorder %s662_s12, %s564_s30  ;;  %p570_p13 = scmp.lt.s32.totalorder %s564_s30, %s564_s30 }
  0x1c   :  { %p571_p0 = por %p570_p13, %p569_p12 }
  0x1e   :  { %p572_p1 = pnand %p571_p0, %p565_p11 }
  0x20   :  { %575 = shalt.err (!%p572_p1)
}
  0x21   :  { %s606_s0 = smov 128   ;;  %s607_s10 = smov 8  }
  0x22   :  { %50 = dma.hbm_to_vmem [thread:$0]  %s762_s7, 256, %s662_s12, [#allocation6], %s606_s0, %s606_s0, %s607_s10  }
  0x23   :  { %598 = dma.done.wait [#allocation3], 128  }
  0x24   :  { %599 = vsyncadd [#allocation3], 4294967168 }
  0x25   :  { %600 = dma.done.wait [#allocation6], 256  }
  0x26   :  { %601 = vsyncadd [#allocation6], 4294967040  ;;  %v608_v0 = vmov 0.0|0.0   ;;  %vm609_vm0 = vmmov 0   ;;  %v610_v1 = vmov 0.0   ;;  %v60_v2 = vld [vmem:[%s756_s1] sm:$0xff]  ;;  %v406_v52 = vlaneseq }
  0x27   :  { %496 = vmatprep.subr.bf16.mxu0 %v608_v0  ;;  %464 = vmatprep.mubr.msk.f32.mxu0 %vm609_vm0, %v610_v1  ;;  %v61_v3 = vld [vmem:[%s756_s1 + $0x8] sm:$0xff]  ;;  %v59_v5 = vld [vmem:[#allocation2] sm:$0xff]  ;;  %vm69_vm1 = vcmask 130048   ;;  %v149_v9 = vld [vmem:[%s758_s3 + $0x10] sm:$0xff]  ;;  %vm158_vm2 = vcmask 261120  }
  0x28   :  { %499 = vmatprep.subr.bf16.mxu1 %v608_v0  ;;  %475 = vmatprep.mubr.msk.f32.mxu1 %vm609_vm0, %v610_v1  ;;  %v497_v4 = vpack.c.bf16 %v61_v3, %v60_v2  ;;  %v147_v6 = vld [vmem:[%s758_s3] sm:$0xff]  ;;  %v148_v7 = vld [vmem:[%s758_s3 + $0x8] sm:$0xff]  ;;  %v150_v10 = vld [vmem:[%s758_s3 + $0x18] sm:$0xff]  ;;  %v407_v53 = vand.u32 127, %v406_v52 }
  0x29   :  { %v500_v8 = vpack.c.bf16 %v148_v7, %v147_v6  ;;  %v503_v11 = vpack.c.bf16 %v150_v10, %v149_v9  ;;  %v436_v12 = vld [vmem:[%s757_s2] ss:$0 sm:$0xff]  ;;  %v237_v21 = vld [vmem:[%s760_s5 + $0x8] sm:$0xff]  ;;  %v238_v23 = vld [vmem:[%s760_s5 + $0x10] sm:$0xff] }
  0x2a   :  { %498 = vmatpush3.bf16.msra.mxu0 %v497_v4  ;;  %v236_v20 = vld [vmem:[%s760_s5] sm:$0xff]  ;;  %v239_v24 = vld [vmem:[%s760_s5 + $0x18] sm:$0xff]  ;;  %v324_v34 = vld [vmem:[#allocation5] sm:$0xff]  ;;  %vm408_vm3 = vcmp.lt.s32.totalorder %v407_v53, 2 }
  0x2b   :  { %505 = vmatprep.subr.bf16.mxu0 %v608_v0  ;;  %501 = vmatpush3.bf16.msra.mxu1 %v500_v8  ;;  %v506_v22 = vpack.c.bf16 %v237_v21, %v236_v20  ;;  %v509_v25 = vpack.c.bf16 %v239_v24, %v238_v23  ;;  %v438_v26 = vld [vmem:[%s759_s4] ss:$0 sm:$0xff]  ;;  %v325_v35 = vld [vmem:[#allocation5 + $0x8] sm:$0xff] }
  0x2c   :  { %502 = vmatprep.subr.bf16.mxu1 %v608_v0  ;;  %v512_v36 = vpack.c.bf16 %v325_v35, %v324_v34  ;;  %v440_v37 = vld [vmem:[%s761_s6] ss:$0 sm:$0xff]  ;;  %s611_s6 = smov [#allocation7]  }
  0x2d   :  { %465 = vmatmul.mubr.msk.f32.vlgmr.msra.gmra.mrb[0].mxu0 %vm69_vm1, %v59_v5  ;;  %v442_v45 = vld [vmem:[%s763_s8] ss:$0 sm:$0xff]  ;;  %s426_s14 = sshll.u32 %s611_s6, 4  ;;  %s427_s14 = int_to_ptr.vmem [resolvable:$true] %s426_s14 }
  0x2e   :  { %486 = vmatprep.mubr.msk.f32.mxu0 %vm609_vm0, %v610_v1  ;;  %507 = vmatpush3.bf16.msra.mxu0 %v506_v22  ;;  %s576_s8 = scalar_lea.vmem %s427_s14, 128  ;;  %p581_p3 = scmp.lt.s32.totalorder %s427_s14, %s427_s14 }
  0x2f   :  { %504 = vmatpush3.bf16.msra.mxu1 %v503_v11  ;;  %508 = vmatprep.subr.bf16.mxu0 %v608_v0  ;;  %p577_p2 = scmp.ne.s32.totalorder %s427_s14, %s576_s8  ;;  %p582_p4 = scmp.lt.s32.totalorder %s576_s8, %s576_s8 }
  0x30   :  { %511 = vmatprep.subr.bf16.mxu1 %v608_v0 }
  0x31   :  { %p583_p5 = por %p582_p4, %p581_p3 }
  0x32   :  { %510 = vmatpush3.bf16.msra.mxu0 %v509_v25 }
  0x33   :  { %p584_p6 = pnand %p583_p5, %p577_p2 }
 0x100   :  { %v139_v13 = vpop.f32.mrb[0].mxu0 }
 0x101   :  { %v140_v14 = vadd.f32 %v436_v12, %v139_v13  ;;  %v466_v15 = vpop.f32.mrb[1].mxu0 }
 0x103   :  { %v143_v16 = vmul.f32 0.5, %v140_v14 }
 0x105   :  { %522 = vtanh.f32 %v143_v16 }
 0x10f   :  { %v523_v17 = vpop.eup %522 }
 0x110   :  { %v145_v18 = vadd.f32 1.0, %v523_v17 }
 0x112   :  { %v146_v19 = vmul.f32 0.5, %v145_v18 }
 0x114   :  { %476 = vmatmul.mubr.msk.f32.vlgmr.msra.gmra.mrb[0].mxu1 %vm158_vm2, %v146_v19 }
 0x115   :  { %493 = vmatprep.mubr.msk.f32.mxu1 %vm609_vm0, %v610_v1  ;;  %513 = vmatpush3.bf16.msra.mxu1 %v512_v36 }
 0x1e7   :  { %v228_v27 = vpop.f32.mrb[0].mxu1 }
 0x1e8   :  { %v229_v28 = vadd.f32 %v438_v26, %v228_v27  ;;  %v477_v29 = vpop.f32.mrb[1].mxu1 }
 0x1ea   :  { %v232_v30 = vmul.f32 0.5, %v229_v28 }
 0x1ec   :  { %524 = vtanh.f32 %v232_v30 }
 0x1f6   :  { %v525_v31 = vpop.eup %524 }
 0x1f7   :  { %v234_v32 = vadd.f32 1.0, %v525_v31 }
 0x1f9   :  { %v235_v33 = vmul.f32 0.5, %v234_v32 }
 0x1fb   :  { %487 = vmatmul.mubr.msk.f32.vlgmr.msra.gmra.mrb[2].mxu0 %vm158_vm2, %v235_v33 }
 0x2ce   :  { %v316_v38 = vpop.f32.mrb[2].mxu0 }
 0x2cf   :  { %v317_v39 = vadd.f32 %v440_v37, %v316_v38  ;;  %v488_v40 = vpop.f32.mrb[3].mxu0 }
 0x2d1   :  { %v320_v41 = vmul.f32 0.5, %v317_v39 }
 0x2d3   :  { %526 = vtanh.f32 %v320_v41 }
 0x2dd   :  { %v527_v42 = vpop.eup %526 }
 0x2de   :  { %v322_v43 = vadd.f32 1.0, %v527_v42 }
 0x2e0   :  { %v323_v44 = vmul.f32 0.5, %v322_v43 }
 0x2e2   :  { %494 = vmatmul.mubr.msk.f32.vlgmr.msra.gmra.mrb[2].mxu1 %vm69_vm1, %v323_v44 }
 0x3b5   :  { %v402_v46 = vpop.f32.mrb[2].mxu1 }
 0x3b6   :  { %v403_v47 = vadd.f32 %v442_v45, %v402_v46  ;;  %v495_v48 = vpop.f32.mrb[3].mxu1 }
 0x3b8   :  { %409 = vmax.xlane.f32.xlu0 %v403_v47 }
 0x445   :  { %v410_v49 = vpop.xlane.xlu0 %409 }
 0x446   :  { %v411_v50 = vsub.f32 %v403_v47, %v410_v49 }
 0x448   :  { %v412_v51 = vmul.f32 1.442695, %v411_v50 }
 0x44a   :  { %528 = vpow2.f32 %v412_v51 }
 0x454   :  { %v529_v54 = vpop.eup %528 }
 0x455   :  { %v414_v55 = vsel %vm408_vm3, %v529_v54, 0.0 }
 0x456   :  { %415 = vadd.xlane.f32.xlu0 %v414_v55 }
 0x4e3   :  { %v416_v56 = vpop.xlane.xlu0 %415 }
 0x4e4   :  { %530 = vrcp.f32 %v416_v56 }
 0x4ee   :  { %v531_v57 = vpop.eup %530 }
 0x4ef   :  { %v418_v58 = vmul.f32 %v531_v57, %v414_v55 }
 0x4f1   :  { %419 = vst [vmem:[#allocation7] sm:$0xff] %v418_v58 }
 0x4f2   :  { %587 = shalt.err (!%p584_p6)
}
 0x4f3   :  { %s588_s17 = scalar_lea.hbm %s764_s9, 128 }
 0x4f4   :  { %p589_p7 = scmp.ne.s32.totalorder %s764_s9, %s588_s17  ;;  %p592_p8 = scmp.lt.u32.totalorder %s588_s17, %s764_s9 }
 0x4f6   :  { %p594_p9 = pnand %p592_p8, %p589_p7 }
 0x4f8   :  { %597 = shalt.err (!%p594_p9)
}
 0x4f9   :  { %429 = dma.vmem_to_hbm [thread:$0]  %s427_s14, 128, %s764_s9, [#allocation4]  }
 0x4fa   :  { %602 = dma.done.wait [#allocation4], 128  }
 0x4fb   :  { %603 = vsyncadd [#allocation4], 4294967168 }
 0x4fc   :  { %433 = vsyncpa [#allocation3], 1 }
 0x4fd   :  { %434 = vsyncpa [#allocation6], 1 }
 0x4fe   :  { %435 = vsyncpa [#allocation4], 1 }

</bundles_post_ra>
